<compile_context>
chip_gen: v7x
topology: tpu7x:2x2x1
jax: 0.10.0
libtpu: 0.0.40
codegen_flags: <defaults>
</compile_context>

<pallas_src>
import math

import jax
import jax.numpy as jnp
from jax.experimental import pallas as pl
from jax.experimental.pallas import tpu as pltpu

# ----------------------------- configuration -------------------------------
B = 2          # batch
C_IN = 3       # input channels
H = W = 16     # image size
PATCH = 8      # encoder.patch_size
GH, GW = H // PATCH, W // PATCH          # patch grid (2, 2)
NUM_PATCHES = GH * GW                     # 4
SEQ = NUM_PATCHES + 1                     # +1 cls token
D_MODEL = 32
N_HEADS = 2
D_HEAD = D_MODEL // N_HEADS
D_MLP = 64
N_CLS = 8

PATCH_DIM = C_IN * PATCH * PATCH          # 192
BT = B * NUM_PATCHES                      # 8   (patch-token rows, kept first)
BS = B * SEQ                              # 10  (real token rows)
BS_P = ((BS + 7) // 8) * 8                # 16  (token rows padded to sublane multiple)
HBS_P = N_HEADS * BS_P                    # 32  (head-stacked rows)
HW = H * W                                # 256
LANES = 128

# bf16 weight-slab row offsets (all multiples of 16 -> clean bf16 sublane packing)
W_PATCH = 0
W_QKV = W_PATCH + PATCH_DIM
W_PROJ = W_QKV + D_MODEL
W_FC1 = W_PROJ + D_MODEL
W_FC2 = W_FC1 + D_MODEL
W_HEAD = W_FC2 + D_MLP
W_ROWS = W_HEAD + N_CLS                   # 360

# f32 slab row offsets
F_TOKBIAS = 0                             # BS_P rows: patch_b+pos / cls+pos / zeros(pad)
F_LN1G = F_TOKBIAS + BS_P
F_LN1B = F_LN1G + 1
F_QKVB = F_LN1B + 1
F_PROJB = F_QKVB + 1
F_LN2G = F_PROJB + 1
F_LN2B = F_LN2G + 1
F_FC1B = F_LN2B + 1
F_FC2B = F_FC1B + 1
F_LNFG = F_FC2B + 1
F_LNFB = F_LNFG + 1
F_HEADB = F_LNFB + 1                      # N_CLS rows (stored as a column)
F_MASK = F_HEADB + N_CLS                  # HBS_P rows: additive attention mask
F_ROWS = F_MASK + HBS_P                   # 66


# ----------------------------- fused Pallas kernel --------------------------
def _layernorm(x, g, b, eps=1e-5):
    mu = jnp.mean(x, axis=-1, keepdims=True)
    xc = x - mu
    var = jnp.mean(xc * xc, axis=-1, keepdims=True)
    return xc * jax.lax.rsqrt(var + eps) * g + b


def _segmenter_kernel(patches_ref, wslab_ref, fslab_ref, winterp_ref, o_ref):
    f32, bf16 = jnp.float32, jnp.bfloat16

    # --- unpack slabs (static, offset-0 lane slices) ---
    patch_w = wslab_ref[W_PATCH:W_PATCH + PATCH_DIM, 0:D_MODEL]
    qkv_w = wslab_ref[W_QKV:W_QKV + D_MODEL, 0:3 * D_MODEL]
    proj_w = wslab_ref[W_PROJ:W_PROJ + D_MODEL, 0:D_MODEL]
    fc1_w = wslab_ref[W_FC1:W_FC1 + D_MODEL, 0:D_MLP]
    fc2_w = wslab_ref[W_FC2:W_FC2 + D_MLP, 0:D_MODEL]
    head_wt = wslab_ref[W_HEAD:W_HEAD + N_CLS, 0:D_MODEL]

    tokbias = fslab_ref[F_TOKBIAS:F_TOKBIAS + BS_P, 0:D_MODEL]
    ln1_g = fslab_ref[F_LN1G:F_LN1G + 1, 0:D_MODEL]
    ln1_b = fslab_ref[F_LN1B:F_LN1B + 1, 0:D_MODEL]
    qkv_b = fslab_ref[F_QKVB:F_QKVB + 1, 0:3 * D_MODEL]
    proj_b = fslab_ref[F_PROJB:F_PROJB + 1, 0:D_MODEL]
    ln2_g = fslab_ref[F_LN2G:F_LN2G + 1, 0:D_MODEL]
    ln2_b = fslab_ref[F_LN2B:F_LN2B + 1, 0:D_MODEL]
    fc1_b = fslab_ref[F_FC1B:F_FC1B + 1, 0:D_MLP]
    fc2_b = fslab_ref[F_FC2B:F_FC2B + 1, 0:D_MODEL]
    lnf_g = fslab_ref[F_LNFG:F_LNFG + 1, 0:D_MODEL]
    lnf_b = fslab_ref[F_LNFB:F_LNFB + 1, 0:D_MODEL]
    head_b = fslab_ref[F_HEADB:F_HEADB + N_CLS, 0:1]
    attn_bias = fslab_ref[F_MASK:F_MASK + HBS_P, 0:HBS_P]

    # --- patch embed + positional / cls additive term (cls & pad rows are zero inputs) ---
    x = jnp.dot(patches_ref[...].astype(bf16), patch_w,
                preferred_element_type=f32) + tokbias                         # (BS_P, D)

    # --- transformer block: pre-LN MHA (all heads & images in one masked score matmul) ---
    y = _layernorm(x, ln1_g, ln1_b)
    qkv = jnp.dot(y.astype(bf16), qkv_w, preferred_element_type=f32) + qkv_b  # head-major cols
    qkv_st = jnp.concatenate(
        [qkv[:, h * 3 * D_HEAD:(h + 1) * 3 * D_HEAD] for h in range(N_HEADS)], axis=0)
    q_st = qkv_st[:, 0:D_HEAD]                 # softmax scale pre-folded into W_q / b_q
    k_st = qkv_st[:, D_HEAD:2 * D_HEAD]
    v_st = qkv_st[:, 2 * D_HEAD:3 * D_HEAD]
    s = jax.lax.dot_general(q_st.astype(bf16), k_st.astype(bf16),
                            (((1,), (1,)), ((), ())), preferred_element_type=f32)
    s = s + attn_bias                          # -1e30 off the (head, image) diagonal blocks
    m = jnp.max(s, axis=-1, keepdims=True)
    p = jnp.exp(s - m)
    p = p * pl.reciprocal(jnp.sum(p, axis=-1, keepdims=True), approx=True)
    pv = jnp.dot(p.astype(bf16), v_st.astype(bf16), preferred_element_type=f32)  # (HBS_P, Dh)
    attn = jnp.concatenate(
        [pv[h * BS_P:(h + 1) * BS_P, :] for h in range(N_HEADS)], axis=1)         # (BS_P, D)
    x = x + jnp.dot(attn.astype(bf16), proj_w, preferred_element_type=f32) + proj_b

    # --- transformer block: pre-LN MLP ---
    y = _layernorm(x, ln2_g, ln2_b)
    h1 = jnp.dot(y.astype(bf16), fc1_w, preferred_element_type=f32) + fc1_b
    # TODO(synk): torch nn.GELU default is exact erf; tanh approximation used here (EUP-friendly).
    h1 = jax.nn.gelu(h1, approximate=True)
    x = x + jnp.dot(h1.astype(bf16), fc2_w, preferred_element_type=f32) + fc2_b

    # --- final encoder norm, drop cls/pad rows (patch tokens are rows 0..BT-1) ---
    x = _layernorm(x, lnf_g, lnf_b)
    x_patch = x[0:BT, :]

    # --- decoder head + block-diagonal bilinear upsample (one matmul for the whole batch) ---
    masks_ct = jax.lax.dot_general(head_wt, x_patch.astype(bf16),
                                   (((1,), (1,)), ((), ())),
                                   preferred_element_type=f32) + head_b        # (n_cls, BT)
    logits = jnp.dot(masks_ct.astype(bf16), winterp_ref[...],
                     preferred_element_type=f32)                               # (n_cls, B*H*W)

    # --- softmax over classes (exact divide so probabilities sum to 1) ---
    e = jnp.exp(logits - jnp.max(logits, axis=0, keepdims=True))
    probs = e / jnp.sum(e, axis=0, keepdims=True)
    for b in range(B):
        o_ref[b] = probs[:, b * HW:(b + 1) * HW]


# ----------------------------- parameters & packing -------------------------
def interp_matrix(out_size, in_size):
    """Bilinear interpolation matrix matching F.interpolate(align_corners=False)."""
    i = jnp.arange(out_size, dtype=jnp.float32)
    src = (i + 0.5) * (in_size / out_size) - 0.5
    src = jnp.clip(src, 0.0, in_size - 1)
    lo = jnp.floor(src).astype(jnp.int32)
    hi = jnp.minimum(lo + 1, in_size - 1)
    frac = src - lo.astype(jnp.float32)
    m = jnp.zeros((out_size, in_size), jnp.float32)
    m = m.at[jnp.arange(out_size), lo].add(1.0 - frac)
    m = m.at[jnp.arange(out_size), hi].add(frac)
    return m


def init_params(key):
    ks = jax.random.split(key, 16)
    s = 0.02
    return {
        "patch_w": jax.random.normal(ks[0], (PATCH_DIM, D_MODEL)) * s,
        "patch_b": jnp.zeros((D_MODEL,)),
        "cls_token": jax.random.normal(ks[1], (1, 1, D_MODEL)) * s,
        "pos_embed": jax.random.normal(ks[2], (1, SEQ, D_MODEL)) * s,
        "ln1_g": jnp.ones((D_MODEL,)), "ln1_b": jnp.zeros((D_MODEL,)),
        "qkv_w": jax.random.normal(ks[3], (D_MODEL, 3 * D_MODEL)) * s,
        "qkv_b": jnp.zeros((3 * D_MODEL,)),
        "proj_w": jax.random.normal(ks[4], (D_MODEL, D_MODEL)) * s,
        "proj_b": jnp.zeros((D_MODEL,)),
        "ln2_g": jnp.ones((D_MODEL,)), "ln2_b": jnp.zeros((D_MODEL,)),
        "fc1_w": jax.random.normal(ks[5], (D_MODEL, D_MLP)) * s,
        "fc1_b": jnp.zeros((D_MLP,)),
        "fc2_w": jax.random.normal(ks[6], (D_MLP, D_MODEL)) * s,
        "fc2_b": jnp.zeros((D_MODEL,)),
        "lnf_g": jnp.ones((D_MODEL,)), "lnf_b": jnp.zeros((D_MODEL,)),
        "head_w": jax.random.normal(ks[7], (D_MODEL, N_CLS)) * s,
        "head_b": jnp.zeros((N_CLS,)),
    }


def pack_params(params):
    """One-time packing into lane-dense slabs (done once, outside the hot path)."""
    scale = 1.0 / math.sqrt(D_HEAD)
    qkv_w, qkv_b = params["qkv_w"], params["qkv_b"]
    # reorder qkv columns head-major [h: q,k,v] and fold the softmax scale into q
    wcols, bcols = [], []
    for h in range(N_HEADS):
        sl = slice(h * D_HEAD, (h + 1) * D_HEAD)
        for part, fac in ((0, scale), (1, 1.0), (2, 1.0)):
            wcols.append(qkv_w[:, part * D_MODEL:(part + 1) * D_MODEL][:, sl] * fac)
            bcols.append(qkv_b[part * D_MODEL:(part + 1) * D_MODEL][sl] * fac)
    qkv_w_hm = jnp.concatenate(wcols, axis=1)
    qkv_b_hm = jnp.concatenate(bcols)

    def pad_lanes(a):
        return jnp.pad(a, ((0, 0), (0, LANES - a.shape[1])))

    def row(v):
        return pad_lanes(jnp.asarray(v).reshape(1, -1))

    wslab = jnp.concatenate([
        pad_lanes(params["patch_w"]),
        pad_lanes(qkv_w_hm),
        pad_lanes(params["proj_w"]),
        pad_lanes(params["fc1_w"]),
        pad_lanes(params["fc2_w"]),
        pad_lanes(params["head_w"].T),
    ], axis=0).astype(jnp.bfloat16)                                   # (W_ROWS, 128)

    pos = params["pos_embed"][0]                                      # (SEQ, D), row 0 = cls pos
    tokbias = jnp.concatenate([
        params["patch_b"][None, :] + jnp.tile(pos[1:], (B, 1)),       # patch-token rows
        jnp.tile(params["cls_token"][0] + pos[0:1], (B, 1)),          # cls-token rows
        jnp.zeros((BS_P - BS, D_MODEL), jnp.float32),                 # pad rows
    ], axis=0)                                                        # (BS_P, D)

    # additive attention mask: allow only same (head, image); pad rows get unique ids
    img_tok = jnp.concatenate([
        jnp.repeat(jnp.arange(B), NUM_PATCHES),
        jnp.arange(B),
        B + jnp.arange(BS_P - BS),
    ])
    img_all = jnp.tile(img_tok, (N_HEADS,))
    head_all = jnp.repeat(jnp.arange(N_HEADS), BS_P)
    same = (img_all[:, None] == img_all[None, :]) & (head_all[:, None] == head_all[None, :])
    attn_bias = jnp.where(same, 0.0, -1e30).astype(jnp.float32)       # (HBS_P, HBS_P)

    fslab = jnp.concatenate([
        pad_lanes(tokbias),
        row(params["ln1_g"]), row(params["ln1_b"]),
        row(qkv_b_hm),
        row(params["proj_b"]),
        row(params["ln2_g"]), row(params["ln2_b"]),
        row(params["fc1_b"]),
        row(params["fc2_b"]),
        row(params["lnf_g"]), row(params["lnf_b"]),
        pad_lanes(params["head_b"].reshape(-1, 1)),
        pad_lanes(attn_bias),
    ], axis=0).astype(jnp.float32)                                    # (F_ROWS, 128)

    # block-diagonal bilinear-upsample matrix: one matmul handles the whole batch
    wh = interp_matrix(H, GH)                                         # (H, GH)
    ww = interp_matrix(W, GW)                                         # (W, GW)
    w_interp = jnp.kron(wh, ww).T                                     # (T, H*W)
    wib = jnp.zeros((BT, B * HW), jnp.float32)
    for b in range(B):
        wib = wib.at[b * NUM_PATCHES:(b + 1) * NUM_PATCHES, b * HW:(b + 1) * HW].set(w_interp)
    wib = wib.astype(jnp.bfloat16)                                    # exact fractions in bf16

    return wslab, fslab, wib


# ----------------------------- forward --------------------------------------
@jax.jit
def segmenter_forward(im, wslab, fslab, wib):
    """im: (B, C, H, W) f32 -> class probabilities (B, n_cls, H, W)."""
    b, c, h_im, w_im = im.shape
    gh, gw = h_im // PATCH, w_im // PATCH
    t = gh * gw

    # im2col (pure layout shuffle) + zero rows so the same matmul also emits the cls rows
    patches = im.reshape(b, c, gh, PATCH, gw, PATCH)
    patches = patches.transpose(0, 2, 4, 1, 3, 5).reshape(b * t, c * PATCH * PATCH)
    patches = jnp.pad(patches, ((0, BS_P - b * t), (0, 0)))

    vmem = pl.BlockSpec(memory_space=pltpu.MemorySpace.VMEM)
    probs_flat = pl.pallas_call(
        _segmenter_kernel,
        out_shape=jax.ShapeDtypeStruct((b, N_CLS, h_im * w_im), jnp.float32),
        in_specs=[vmem, vmem, vmem, vmem],
        out_specs=vmem,
    )(patches, wslab, fslab, wib)
    return probs_flat.reshape(b, N_CLS, h_im, w_im)


if __name__ == "__main__":
    key = jax.random.PRNGKey(0)
    k_im, k_par = jax.random.split(key)
    im = jax.random.normal(k_im, (B, C_IN, H, W), dtype=jnp.float32)
    params = init_params(k_par)
    wslab, fslab, wib = pack_params(params)   # one-time packing, hoisted out of the hot path

    probs = segmenter_forward(im, wslab, fslab, wib)
    probs = jax.block_until_ready(probs)

    assert probs.shape == (B, N_CLS, H, W)
    sums = jnp.sum(probs, axis=1)             # class probabilities must sum to 1
    assert jnp.allclose(sums, jnp.ones_like(sums), atol=1e-4)
    print("KERNEL_OK")
</pallas_src>

<mosaic_0001>
module attributes {stable_mosaic.version = 11 : i64} {
  func.func @_segmenter_kernel(%arg0: memref<16x192xf32, #tpu.memory_space<vmem>>, %arg1: memref<360x128xbf16, #tpu.memory_space<vmem>>, %arg2: memref<66x128xf32, #tpu.memory_space<vmem>>, %arg3: memref<8x512xbf16, #tpu.memory_space<vmem>>, %arg4: memref<2x8x256xf32, #tpu.memory_space<vmem>>) attributes {dimension_semantics = [], scalar_prefetch = 0 : i64, scratch_operands = 0 : i64, tpu.core_type = #tpu.core_type<tc>} {
    %c0 = arith.constant 0 : index
    %c0_0 = arith.constant 0 : index
    %0 = vector.load %arg1[%c0, %c0_0] : memref<360x128xbf16, #tpu.memory_space<vmem>>, vector<192x32xbf16>
    %c192 = arith.constant 192 : index
    %c0_1 = arith.constant 0 : index
    %1 = vector.load %arg1[%c192, %c0_1] : memref<360x128xbf16, #tpu.memory_space<vmem>>, vector<32x96xbf16>
    %c224 = arith.constant 224 : index
    %c0_2 = arith.constant 0 : index
    %2 = vector.load %arg1[%c224, %c0_2] : memref<360x128xbf16, #tpu.memory_space<vmem>>, vector<32x32xbf16>
    %c256 = arith.constant 256 : index
    %c0_3 = arith.constant 0 : index
    %3 = vector.load %arg1[%c256, %c0_3] : memref<360x128xbf16, #tpu.memory_space<vmem>>, vector<32x64xbf16>
    %c288 = arith.constant 288 : index
    %c0_4 = arith.constant 0 : index
    %4 = vector.load %arg1[%c288, %c0_4] : memref<360x128xbf16, #tpu.memory_space<vmem>>, vector<64x32xbf16>
    %c352 = arith.constant 352 : index
    %c0_5 = arith.constant 0 : index
    %5 = vector.load %arg1[%c352, %c0_5] : memref<360x128xbf16, #tpu.memory_space<vmem>>, vector<8x32xbf16>
    %c0_6 = arith.constant 0 : index
    %c0_7 = arith.constant 0 : index
    %6 = vector.load %arg2[%c0_6, %c0_7] : memref<66x128xf32, #tpu.memory_space<vmem>>, vector<16x32xf32>
    %c16 = arith.constant 16 : index
    %c0_8 = arith.constant 0 : index
    %7 = vector.load %arg2[%c16, %c0_8] : memref<66x128xf32, #tpu.memory_space<vmem>>, vector<1x32xf32>
    %c17 = arith.constant 17 : index
    %c0_9 = arith.constant 0 : index
    %8 = vector.load %arg2[%c17, %c0_9] : memref<66x128xf32, #tpu.memory_space<vmem>>, vector<1x32xf32>
    %c18 = arith.constant 18 : index
    %c0_10 = arith.constant 0 : index
    %9 = vector.load %arg2[%c18, %c0_10] : memref<66x128xf32, #tpu.memory_space<vmem>>, vector<1x96xf32>
    %c19 = arith.constant 19 : index
    %c0_11 = arith.constant 0 : index
    %10 = vector.load %arg2[%c19, %c0_11] : memref<66x128xf32, #tpu.memory_space<vmem>>, vector<1x32xf32>
    %c20 = arith.constant 20 : index
    %c0_12 = arith.constant 0 : index
    %11 = vector.load %arg2[%c20, %c0_12] : memref<66x128xf32, #tpu.memory_space<vmem>>, vector<1x32xf32>
    %c21 = arith.constant 21 : index
    %c0_13 = arith.constant 0 : index
    %12 = vector.load %arg2[%c21, %c0_13] : memref<66x128xf32, #tpu.memory_space<vmem>>, vector<1x32xf32>
    %c22 = arith.constant 22 : index
    %c0_14 = arith.constant 0 : index
    %13 = vector.load %arg2[%c22, %c0_14] : memref<66x128xf32, #tpu.memory_space<vmem>>, vector<1x64xf32>
    %c23 = arith.constant 23 : index
    %c0_15 = arith.constant 0 : index
    %14 = vector.load %arg2[%c23, %c0_15] : memref<66x128xf32, #tpu.memory_space<vmem>>, vector<1x32xf32>
    %c24 = arith.constant 24 : index
    %c0_16 = arith.constant 0 : index
    %15 = vector.load %arg2[%c24, %c0_16] : memref<66x128xf32, #tpu.memory_space<vmem>>, vector<1x32xf32>
    %c25 = arith.constant 25 : index
    %c0_17 = arith.constant 0 : index
    %16 = vector.load %arg2[%c25, %c0_17] : memref<66x128xf32, #tpu.memory_space<vmem>>, vector<1x32xf32>
    %c26 = arith.constant 26 : index
    %c0_18 = arith.constant 0 : index
    %17 = vector.load %arg2[%c26, %c0_18] : memref<66x128xf32, #tpu.memory_space<vmem>>, vector<8x1xf32>
    %c34 = arith.constant 34 : index
    %c0_19 = arith.constant 0 : index
    %18 = vector.load %arg2[%c34, %c0_19] : memref<66x128xf32, #tpu.memory_space<vmem>>, vector<32x32xf32>
    %c0_20 = arith.constant 0 : index
    %c0_21 = arith.constant 0 : index
    %19 = vector.load %arg0[%c0_20, %c0_21] : memref<16x192xf32, #tpu.memory_space<vmem>>, vector<16x192xf32>
    %20 = arith.truncf %19 : vector<16x192xf32> to vector<16x192xbf16>
    %cst = arith.constant dense<0.000000e+00> : vector<16x32xf32>
    %21 = tpu.matmul %20, %0, %cst {dimension_numbers = #tpu.dot_dimension_numbers<[1], [0], [0], [1], [0, 0, 1, 1], [], []>} : vector<16x192xbf16>, vector<192x32xbf16>, vector<16x32xf32> -> vector<16x32xf32>
    %22 = arith.addf %21, %6 : vector<16x32xf32>
    %cst_22 = arith.constant dense<0.000000e+00> : vector<16xf32>
    %23 = vector.multi_reduction <add>, %22, %cst_22 [1] : vector<16x32xf32> to vector<16xf32>
    %24 = vector.shape_cast %23 : vector<16xf32> to vector<16x1xf32>
    %cst_23 = arith.constant 3.200000e+01 : f32
    %25 = vector.broadcast %cst_23 : f32 to vector<16x1xf32>
    %26 = arith.divf %24, %25 : vector<16x1xf32>
    %27 = vector.broadcast %26 : vector<16x1xf32> to vector<16x32xf32>
    %28 = arith.subf %22, %27 : vector<16x32xf32>
    %29 = arith.mulf %28, %28 : vector<16x32xf32>
    %cst_24 = arith.constant dense<0.000000e+00> : vector<16xf32>
    %30 = vector.multi_reduction <add>, %29, %cst_24 [1] : vector<16x32xf32> to vector<16xf32>
    %31 = vector.shape_cast %30 : vector<16xf32> to vector<16x1xf32>
    %cst_25 = arith.constant 3.200000e+01 : f32
    %32 = vector.broadcast %cst_25 : f32 to vector<16x1xf32>
    %33 = arith.divf %31, %32 : vector<16x1xf32>
    %cst_26 = arith.constant 9.99999974E-6 : f32
    %34 = vector.broadcast %cst_26 : f32 to vector<16x1xf32>
    %35 = arith.addf %33, %34 : vector<16x1xf32>
    %36 = math.rsqrt %35 : vector<16x1xf32>
    %37 = vector.broadcast %36 : vector<16x1xf32> to vector<16x32xf32>
    %38 = arith.mulf %28, %37 : vector<16x32xf32>
    %39 = vector.broadcast %7 : vector<1x32xf32> to vector<16x32xf32>
    %40 = arith.mulf %38, %39 : vector<16x32xf32>
    %41 = vector.broadcast %8 : vector<1x32xf32> to vector<16x32xf32>
    %42 = arith.addf %40, %41 : vector<16x32xf32>
    %43 = arith.truncf %42 : vector<16x32xf32> to vector<16x32xbf16>
    %cst_27 = arith.constant dense<0.000000e+00> : vector<16x96xf32>
    %44 = tpu.matmul %43, %1, %cst_27 {dimension_numbers = #tpu.dot_dimension_numbers<[1], [0], [0], [1], [0, 0, 1, 1], [], []>} : vector<16x32xbf16>, vector<32x96xbf16>, vector<16x96xf32> -> vector<16x96xf32>
    %45 = vector.broadcast %9 : vector<1x96xf32> to vector<16x96xf32>
    %46 = arith.addf %44, %45 : vector<16x96xf32>
    %47 = vector.extract_strided_slice %46 {offsets = [0, 0], sizes = [16, 48], strides = [1, 1]} : vector<16x96xf32> to vector<16x48xf32>
    %48 = vector.extract_strided_slice %46 {offsets = [0, 48], sizes = [16, 48], strides = [1, 1]} : vector<16x96xf32> to vector<16x48xf32>
    %49 = tpu.concatenate %47, %48 in 0 : vector<16x48xf32>, vector<16x48xf32> -> vector<32x48xf32>
    %50 = vector.extract_strided_slice %49 {offsets = [0, 0], sizes = [32, 16], strides = [1, 1]} : vector<32x48xf32> to vector<32x16xf32>
    %51 = vector.extract_strided_slice %49 {offsets = [0, 16], sizes = [32, 16], strides = [1, 1]} : vector<32x48xf32> to vector<32x16xf32>
    %52 = vector.extract_strided_slice %49 {offsets = [0, 32], sizes = [32, 16], strides = [1, 1]} : vector<32x48xf32> to vector<32x16xf32>
    %53 = arith.truncf %50 : vector<32x16xf32> to vector<32x16xbf16>
    %54 = arith.truncf %51 : vector<32x16xf32> to vector<32x16xbf16>
    %cst_28 = arith.constant dense<0.000000e+00> : vector<32x32xf32>
    %55 = tpu.matmul %53, %54, %cst_28 {dimension_numbers = #tpu.dot_dimension_numbers<[1], [1], [0], [0], [0, 0, 1, 0], [], []>} : vector<32x16xbf16>, vector<32x16xbf16>, vector<32x32xf32> -> vector<32x32xf32>
    %56 = arith.addf %55, %18 : vector<32x32xf32>
    %cst_29 = arith.constant dense<0xFF800000> : vector<32xf32>
    %57 = vector.multi_reduction <maximumf>, %56, %cst_29 [1] : vector<32x32xf32> to vector<32xf32>
    %58 = vector.shape_cast %57 : vector<32xf32> to vector<32x1xf32>
    %59 = vector.broadcast %58 : vector<32x1xf32> to vector<32x32xf32>
    %60 = arith.subf %56, %59 : vector<32x32xf32>
    %61 = math.exp %60 : vector<32x32xf32>
    %cst_30 = arith.constant dense<0.000000e+00> : vector<32xf32>
    %62 = vector.multi_reduction <add>, %61, %cst_30 [1] : vector<32x32xf32> to vector<32xf32>
    %63 = vector.shape_cast %62 : vector<32xf32> to vector<32x1xf32>
    %64 = tpu.reciprocal %63 {approx = true} : vector<32x1xf32> -> vector<32x1xf32>
    %65 = vector.broadcast %64 : vector<32x1xf32> to vector<32x32xf32>
    %66 = arith.mulf %61, %65 : vector<32x32xf32>
    %67 = arith.truncf %66 : vector<32x32xf32> to vector<32x32xbf16>
    %68 = arith.truncf %52 : vector<32x16xf32> to vector<32x16xbf16>
    %cst_31 = arith.constant dense<0.000000e+00> : vector<32x16xf32>
    %69 = tpu.matmul %67, %68, %cst_31 {dimension_numbers = #tpu.dot_dimension_numbers<[1], [0], [0], [1], [0, 0, 1, 1], [], []>} : vector<32x32xbf16>, vector<32x16xbf16>, vector<32x16xf32> -> vector<32x16xf32>
    %70 = vector.extract_strided_slice %69 {offsets = [0, 0], sizes = [16, 16], strides = [1, 1]} : vector<32x16xf32> to vector<16x16xf32>
    %71 = vector.extract_strided_slice %69 {offsets = [16, 0], sizes = [16, 16], strides = [1, 1]} : vector<32x16xf32> to vector<16x16xf32>
    %72 = tpu.concatenate %70, %71 in 1 : vector<16x16xf32>, vector<16x16xf32> -> vector<16x32xf32>
    %73 = arith.truncf %72 : vector<16x32xf32> to vector<16x32xbf16>
    %cst_32 = arith.constant dense<0.000000e+00> : vector<16x32xf32>
    %74 = tpu.matmul %73, %2, %cst_32 {dimension_numbers = #tpu.dot_dimension_numbers<[1], [0], [0], [1], [0, 0, 1, 1], [], []>} : vector<16x32xbf16>, vector<32x32xbf16>, vector<16x32xf32> -> vector<16x32xf32>
    %75 = arith.addf %22, %74 : vector<16x32xf32>
    %76 = vector.broadcast %10 : vector<1x32xf32> to vector<16x32xf32>
    %77 = arith.addf %75, %76 : vector<16x32xf32>
    %cst_33 = arith.constant dense<0.000000e+00> : vector<16xf32>
    %78 = vector.multi_reduction <add>, %77, %cst_33 [1] : vector<16x32xf32> to vector<16xf32>
    %79 = vector.shape_cast %78 : vector<16xf32> to vector<16x1xf32>
    %cst_34 = arith.constant 3.200000e+01 : f32
    %80 = vector.broadcast %cst_34 : f32 to vector<16x1xf32>
    %81 = arith.divf %79, %80 : vector<16x1xf32>
    %82 = vector.broadcast %81 : vector<16x1xf32> to vector<16x32xf32>
    %83 = arith.subf %77, %82 : vector<16x32xf32>
    %84 = arith.mulf %83, %83 : vector<16x32xf32>
    %cst_35 = arith.constant dense<0.000000e+00> : vector<16xf32>
    %85 = vector.multi_reduction <add>, %84, %cst_35 [1] : vector<16x32xf32> to vector<16xf32>
    %86 = vector.shape_cast %85 : vector<16xf32> to vector<16x1xf32>
    %cst_36 = arith.constant 3.200000e+01 : f32
    %87 = vector.broadcast %cst_36 : f32 to vector<16x1xf32>
    %88 = arith.divf %86, %87 : vector<16x1xf32>
    %cst_37 = arith.constant 9.99999974E-6 : f32
    %89 = vector.broadcast %cst_37 : f32 to vector<16x1xf32>
    %90 = arith.addf %88, %89 : vector<16x1xf32>
    %91 = math.rsqrt %90 : vector<16x1xf32>
    %92 = vector.broadcast %91 : vector<16x1xf32> to vector<16x32xf32>
    %93 = arith.mulf %83, %92 : vector<16x32xf32>
    %94 = vector.broadcast %11 : vector<1x32xf32> to vector<16x32xf32>
    %95 = arith.mulf %93, %94 : vector<16x32xf32>
    %96 = vector.broadcast %12 : vector<1x32xf32> to vector<16x32xf32>
    %97 = arith.addf %95, %96 : vector<16x32xf32>
    %98 = arith.truncf %97 : vector<16x32xf32> to vector<16x32xbf16>
    %cst_38 = arith.constant dense<0.000000e+00> : vector<16x64xf32>
    %99 = tpu.matmul %98, %3, %cst_38 {dimension_numbers = #tpu.dot_dimension_numbers<[1], [0], [0], [1], [0, 0, 1, 1], [], []>} : vector<16x32xbf16>, vector<32x64xbf16>, vector<16x64xf32> -> vector<16x64xf32>
    %100 = vector.broadcast %13 : vector<1x64xf32> to vector<16x64xf32>
    %101 = arith.addf %99, %100 : vector<16x64xf32>
    %102 = arith.mulf %101, %101 : vector<16x64xf32>
    %103 = arith.mulf %101, %102 : vector<16x64xf32>
    %cst_39 = arith.constant 4.471500e-02 : f32
    %104 = vector.broadcast %cst_39 : f32 to vector<16x64xf32>
    %105 = arith.mulf %104, %103 : vector<16x64xf32>
    %106 = arith.addf %101, %105 : vector<16x64xf32>
    %cst_40 = arith.constant 0.797884583 : f32
    %107 = vector.broadcast %cst_40 : f32 to vector<16x64xf32>
    %108 = arith.mulf %107, %106 : vector<16x64xf32>
    %109 = math.tanh %108 : vector<16x64xf32>
    %cst_41 = arith.constant 1.000000e+00 : f32
    %110 = vector.broadcast %cst_41 : f32 to vector<16x64xf32>
    %111 = arith.addf %110, %109 : vector<16x64xf32>
    %cst_42 = arith.constant 5.000000e-01 : f32
    %112 = vector.broadcast %cst_42 : f32 to vector<16x64xf32>
    %113 = arith.mulf %112, %111 : vector<16x64xf32>
    %114 = arith.mulf %101, %113 : vector<16x64xf32>
    %115 = arith.truncf %114 : vector<16x64xf32> to vector<16x64xbf16>
    %cst_43 = arith.constant dense<0.000000e+00> : vector<16x32xf32>
    %116 = tpu.matmul %115, %4, %cst_43 {dimension_numbers = #tpu.dot_dimension_numbers<[1], [0], [0], [1], [0, 0, 1, 1], [], []>} : vector<16x64xbf16>, vector<64x32xbf16>, vector<16x32xf32> -> vector<16x32xf32>
    %117 = arith.addf %77, %116 : vector<16x32xf32>
    %118 = vector.broadcast %14 : vector<1x32xf32> to vector<16x32xf32>
    %119 = arith.addf %117, %118 : vector<16x32xf32>
    %cst_44 = arith.constant dense<0.000000e+00> : vector<16xf32>
    %120 = vector.multi_reduction <add>, %119, %cst_44 [1] : vector<16x32xf32> to vector<16xf32>
    %121 = vector.shape_cast %120 : vector<16xf32> to vector<16x1xf32>
    %cst_45 = arith.constant 3.200000e+01 : f32
    %122 = vector.broadcast %cst_45 : f32 to vector<16x1xf32>
    %123 = arith.divf %121, %122 : vector<16x1xf32>
    %124 = vector.broadcast %123 : vector<16x1xf32> to vector<16x32xf32>
    %125 = arith.subf %119, %124 : vector<16x32xf32>
    %126 = arith.mulf %125, %125 : vector<16x32xf32>
    %cst_46 = arith.constant dense<0.000000e+00> : vector<16xf32>
    %127 = vector.multi_reduction <add>, %126, %cst_46 [1] : vector<16x32xf32> to vector<16xf32>
    %128 = vector.shape_cast %127 : vector<16xf32> to vector<16x1xf32>
    %cst_47 = arith.constant 3.200000e+01 : f32
    %129 = vector.broadcast %cst_47 : f32 to vector<16x1xf32>
    %130 = arith.divf %128, %129 : vector<16x1xf32>
    %cst_48 = arith.constant 9.99999974E-6 : f32
    %131 = vector.broadcast %cst_48 : f32 to vector<16x1xf32>
    %132 = arith.addf %130, %131 : vector<16x1xf32>
    %133 = math.rsqrt %132 : vector<16x1xf32>
    %134 = vector.broadcast %133 : vector<16x1xf32> to vector<16x32xf32>
    %135 = arith.mulf %125, %134 : vector<16x32xf32>
    %136 = vector.broadcast %15 : vector<1x32xf32> to vector<16x32xf32>
    %137 = arith.mulf %135, %136 : vector<16x32xf32>
    %138 = vector.broadcast %16 : vector<1x32xf32> to vector<16x32xf32>
    %139 = arith.addf %137, %138 : vector<16x32xf32>
    %140 = vector.extract_strided_slice %139 {offsets = [0, 0], sizes = [8, 32], strides = [1, 1]} : vector<16x32xf32> to vector<8x32xf32>
    %141 = arith.truncf %140 : vector<8x32xf32> to vector<8x32xbf16>
    %cst_49 = arith.constant dense<0.000000e+00> : vector<8x8xf32>
    %142 = tpu.matmul %5, %141, %cst_49 {dimension_numbers = #tpu.dot_dimension_numbers<[1], [1], [0], [0], [0, 0, 1, 0], [], []>} : vector<8x32xbf16>, vector<8x32xbf16>, vector<8x8xf32> -> vector<8x8xf32>
    %143 = vector.broadcast %17 : vector<8x1xf32> to vector<8x8xf32>
    %144 = arith.addf %142, %143 : vector<8x8xf32>
    %145 = arith.truncf %144 : vector<8x8xf32> to vector<8x8xbf16>
    %c0_50 = arith.constant 0 : index
    %c0_51 = arith.constant 0 : index
    %146 = vector.load %arg3[%c0_50, %c0_51] : memref<8x512xbf16, #tpu.memory_space<vmem>>, vector<8x512xbf16>
    %cst_52 = arith.constant dense<0.000000e+00> : vector<8x512xf32>
    %147 = tpu.matmul %145, %146, %cst_52 {dimension_numbers = #tpu.dot_dimension_numbers<[1], [0], [0], [1], [0, 0, 1, 1], [], []>} : vector<8x8xbf16>, vector<8x512xbf16>, vector<8x512xf32> -> vector<8x512xf32>
    %cst_53 = arith.constant dense<0xFF800000> : vector<512xf32>
    %148 = vector.multi_reduction <maximumf>, %147, %cst_53 [0] : vector<8x512xf32> to vector<512xf32>
    %149 = vector.shape_cast %148 : vector<512xf32> to vector<1x512xf32>
    %150 = vector.broadcast %149 : vector<1x512xf32> to vector<8x512xf32>
    %151 = arith.subf %147, %150 : vector<8x512xf32>
    %152 = math.exp %151 : vector<8x512xf32>
    %cst_54 = arith.constant dense<0.000000e+00> : vector<512xf32>
    %153 = vector.multi_reduction <add>, %152, %cst_54 [0] : vector<8x512xf32> to vector<512xf32>
    %154 = vector.shape_cast %153 : vector<512xf32> to vector<1x512xf32>
    %155 = vector.broadcast %154 : vector<1x512xf32> to vector<8x512xf32>
    %156 = arith.divf %152, %155 : vector<8x512xf32>
    %157 = vector.extract_strided_slice %156 {offsets = [0, 0], sizes = [8, 256], strides = [1, 1]} : vector<8x512xf32> to vector<8x256xf32>
    %c0_55 = arith.constant 0 : index
    %c0_56 = arith.constant 0 : index
    %c0_57 = arith.constant 0 : index
    %158 = vector.load %arg4[%c0_55, %c0_56, %c0_57] : memref<2x8x256xf32, #tpu.memory_space<vmem>>, vector<1x8x256xf32>
    %159 = vector.shape_cast %158 : vector<1x8x256xf32> to vector<8x256xf32>
    %160 = vector.shape_cast %157 : vector<8x256xf32> to vector<1x8x256xf32>
    tpu.vector_store %arg4[%c0_55, %c0_56, %c0_57], %160 {strides = array<i32>} : memref<2x8x256xf32, #tpu.memory_space<vmem>>, vector<1x8x256xf32>,
    %161 = vector.extract_strided_slice %156 {offsets = [0, 256], sizes = [8, 256], strides = [1, 1]} : vector<8x512xf32> to vector<8x256xf32>
    %c1 = arith.constant 1 : index
    %c0_58 = arith.constant 0 : index
    %c0_59 = arith.constant 0 : index
    %162 = vector.load %arg4[%c1, %c0_58, %c0_59] : memref<2x8x256xf32, #tpu.memory_space<vmem>>, vector<1x8x256xf32>
    %163 = vector.shape_cast %162 : vector<1x8x256xf32> to vector<8x256xf32>
    %164 = vector.shape_cast %161 : vector<8x256xf32> to vector<1x8x256xf32>
    tpu.vector_store %arg4[%c1, %c0_58, %c0_59], %164 {strides = array<i32>} : memref<2x8x256xf32, #tpu.memory_space<vmem>>, vector<1x8x256xf32>,
    return
  }
}

</mosaic_0001>

<bundles_post_ra>
// kernel: segmenter_forward.1
= control target key start
LH: loop header
LB: loop body
LE: loop exit
PB: predicated region body
PF: predicated region fallthrough
CT: control target
= control target key end

     0   :  { %v1245_v0 = vmov 0   ;;  %vm158_vm0 = vcmask 523264   ;;  %vm203_vm1 = vcmask 261120   ;;  %v1246_v40 = vmov 0.0   ;;  %s1248_s8 = smov 80   ;;  %s1249_s9 = smov 112   ;;  %s1522_s1 = inlined_call_operand.vmem [shape: bf16[360,128], index: 1, kind: input, shape index: {}]   ;;  %s1523_s0 = inlined_call_operand.vmem [shape: f32[16,192], index: 0, kind: input, shape index: {}]   ;;  %s1524_s2 = inlined_call_operand.vmem [shape: f32[66,128], index: 2, kind: input, shape index: {}]   ;;  %s1525_s3 = inlined_call_operand.vmem [shape: bf16[8,512], index: 3, kind: input, shape index: {}]   ;;  %s1526_s4 = inlined_call_operand.vmem [shape: f32[2,8,256], index: 4, kind: output, shape index: {}]  }
   0x1   :  { %162 = vmatprep.subr.bf16.mxu0 %v1245_v0  ;;  %v1173_v1 = vld [vmem:[%s1522_s1] sm:$0xff]   ;;  %1172 = vset.pattern.permute.xlu0 %v1245_v0  ;;  %v1174_v2 = vld [vmem:[%s1522_s1 + $0x8] sm:$0xff]   ;;  %v1175_v3 = vld [vmem:[%s1522_s1 + $0x10] sm:$0xff]   ;;  %vm1247_vm2 = vmmov 0   ;;  %vm320_vm3 = vcmask 130048   ;;  %s1250_s18 = smov 96  }
   0x2   :  { %163 = vmatpush1.bf16.msra.mxu0 %v1173_v1  ;;  %v1176_v4 = vld [vmem:[%s1522_s1 + $0x18] sm:$0xff]   ;;  %v81_v5 = vld [vmem:[%s1523_s0 + $0x8] sm:$0xff]  ;;  %v1177_v7 = vld [vmem:[%s1522_s1 + $0x20] sm:$0xff]   ;;  %1095 = vmatprep.subr.bf16.mxu1 %v1246_v40  ;;  %s1251_s23 = smov 16   ;;  %vm847_vm4 = vcmask 1043456   ;;  %vm843_vm5 = vcmask 64512  }
   0x3   :  { %164 = vmatprep.subr.bf16.mxu0 %v1245_v0  ;;  %v83_v6 = vld [vmem:[%s1523_s0 + $0x18] sm:$0xff]  ;;  %v1178_v9 = vld [vmem:[%s1522_s1 + $0x28] sm:$0xff]   ;;  %v1179_v10 = vld [vmem:[%s1522_s1 + $0x30] sm:$0xff]   ;;  %1099 = vmatprep.mubr.msk.bf16.mxu1 %vm1247_vm2, %v1246_v40 }
   0x4   :  { %v85_v8 = vpack.c.bf16 %v83_v6, %v81_v5  ;;  %v1180_v11 = vld [vmem:[%s1522_s1 + $0x38] sm:$0xff]   ;;  %v1181_v12 = vld [vmem:[%s1522_s1 + $0x40] sm:$0xff]   ;;  %v1182_v13 = vld [vmem:[%s1522_s1 + $0x48] sm:$0xff]  }
   0x5   :  { %v1183_v14 = vld [vmem:[%s1522_s1 + $0x50] sm:$0xff]   ;;  %v1184_v15 = vld [vmem:[%s1522_s1 + $0x58] sm:$0xff]   ;;  %v80_v16 = vld [vmem:[%s1523_s0] sm:$0xff] }
   0x6   :  { %165 = vmatpush1.bf16.msra.mxu0 %v1174_v2  ;;  %1031 = vmatprep.mubr.msk.bf16.mxu0 %vm158_vm0, %v85_v8  ;;  %v82_v17 = vld [vmem:[%s1523_s0 + $0x10] sm:$0xff]  ;;  %v63_v19 = vld [vmem:[%s1524_s2] sm:$0xff]  ;;  %v64_v21 = vld [vmem:[%s1524_s2 + $0x8] sm:$0xff] }
   0x7   :  { %166 = vmatprep.subr.bf16.mxu0 %v1245_v0  ;;  %v84_v18 = vpack.c.bf16 %v82_v17, %v80_v16  ;;  %v1185_v39 = vld [vmem:[%s1522_s1 + $0x60] sm:$0xff]   ;;  %v1186_v41 = vld [vmem:[%s1522_s1 + $0x68] sm:$0xff]   ;;  %v1032_v50 = vld [vmem:[%s1524_s2 + $0x10] ss:$0 sm:$0xff] }
   0x8   :  { %1096 = vmatpush3.bf16.msra.mxu1 %v1185_v39  ;;  %v1033_v54 = vld [vmem:[%s1524_s2 + $0x11] ss:$0 sm:$0xff]  ;;  %v1034_v59 = vld [vmem:[%s1524_s2 + $0x12] ss:$0 sm:$0xff] }
   0x9   :  { %1097 = vmatprep.subr.bf16.mxu1 %v1246_v40 }
   0xa   :  { %167 = vmatpush1.bf16.msra.mxu0 %v1175_v3 }
   0xb   :  { %168 = vmatprep.subr.bf16.mxu0 %v1245_v0 }
   0xc   :  { %1098 = vmatpush3.bf16.msra.mxu1 %v1186_v41 }
   0xe   :  { %169 = vmatpush1.bf16.msra.mxu0 %v1176_v4 }
   0xf   :  { %170 = vmatprep.subr.bf16.mxu0 %v1245_v0 }
  0x12   :  { %171 = vmatpush1.bf16.msra.mxu0 %v1177_v7 }
  0x13   :  { %172 = vmatprep.subr.bf16.mxu0 %v1245_v0 }
  0x16   :  { %173 = vmatpush1.bf16.msra.mxu0 %v1178_v9 }
  0x17   :  { %174 = vmatprep.subr.bf16.mxu0 %v1245_v0 }
  0x1a   :  { %175 = vmatpush1.bf16.msra.mxu0 %v1179_v10 }
  0x1b   :  { %176 = vmatprep.subr.bf16.mxu0 %v1245_v0 }
  0x1e   :  { %177 = vmatpush1.bf16.msra.mxu0 %v1180_v11 }
  0x1f   :  { %178 = vmatprep.subr.bf16.mxu0 %v1245_v0 }
  0x22   :  { %179 = vmatpush1.bf16.msra.mxu0 %v1181_v12 }
  0x23   :  { %180 = vmatprep.subr.bf16.mxu0 %v1245_v0 }
  0x26   :  { %181 = vmatpush1.bf16.msra.mxu0 %v1182_v13  ;;  %v78_v13 = vld [vmem:[%s1524_s2 + $0x32] sm:$0xff] }
  0x27   :  { %182 = vmatprep.subr.bf16.mxu0 %v1245_v0 }
  0x2a   :  { %183 = vmatpush1.bf16.msra.mxu0 %v1183_v14  ;;  %v76_v14 = vld [vmem:[%s1524_s2 + $0x22] sm:$0xff] }
  0x2b   :  { %184 = vmatprep.subr.bf16.mxu0 %v1245_v0 }
  0x2e   :  { %185 = vmatpush1.bf16.msra.mxu0 %v1184_v15 }
  0x2f   :  { %1135 = vmatprep.subr.bf16.mxu0 %v1246_v40 }
  0x31   :  { %195 = vmatmul.mubr.bf16.vlgmr.msra.gmra.mrb[0].mxu0 %v84_v18  ;;  %v77_v18 = vld [vmem:[%s1524_s2 + $0x2a] sm:$0xff] }
  0x32   :  { %1143 = vmatprep.mubr.msk.bf16.mxu0 %vm1247_vm2, %v1246_v40 }
 0x104   :  { %v196_v20 = vpop.f32.mrb[0].mxu0 }
 0x105   :  { %v1345_v22 = vadd.f32 %v196_v20, %v63_v19  ;;  %v198_v23 = vpop.f32.mrb[1].mxu0 }
 0x106   :  { %v199_v24 = vpop.f32.mrb[2].mxu0 }
 0x107   :  { %v1347_v25 = vadd.f32 %v199_v24, %v64_v21  ;;  %v201_v26 = vpop.f32.mrb[3].mxu0  ;;  %v204_v27 = vsel %vm203_vm1, %v1345_v22, 0.0  ;;  %v79_v24 = vld [vmem:[%s1524_s2 + $0x3a] sm:$0xff] }
 0x108   :  { %205 = vadd.xlane.f32.xlu0 %v204_v27 }
 0x109   :  { %v207_v28 = vsel %vm203_vm1, %v1347_v25, 0.0 }
 0x10c   :  { %208 = vadd.xlane.f32.xlu0 %v207_v28 }
 0x195   :  { %v206_v29 = vpop.xlane.xlu0 %205 }
 0x196   :  { %v211_v30 = vmul.f32 0.03125, %v206_v29 }
 0x198   :  { %v213_v31 = vsub.f32 %v1345_v22, %v211_v30 }
 0x199   :  { %v209_v32 = vpop.xlane.xlu0 %208 }
 0x19a   :  { %v212_v33 = vmul.f32 0.03125, %v209_v32  ;;  %v215_v34 = vmul.f32 %v213_v31, %v213_v31 }
 0x19c   :  { %v214_v35 = vsub.f32 %v1347_v25, %v212_v33  ;;  %v217_v36 = vsel %vm203_vm1, %v215_v34, 0.0 }
 0x19d   :  { %218 = vadd.xlane.f32.xlu1 %v217_v36 }
 0x19e   :  { %v216_v37 = vmul.f32 %v214_v35, %v214_v35 }
 0x1a0   :  { %v220_v38 = vsel %vm203_vm1, %v216_v37, 0.0 }
 0x1a1   :  { %221 = vadd.xlane.f32.xlu1 %v220_v38 }
 0x22a   :  { %v219_v42 = vpop.xlane.xlu1 %218 }
 0x22b   :  { %v223_v43 = vmul.f32 0.03125, %v219_v42 }
 0x22d   :  { %v225_v44 = vadd.f32 1e-05, %v223_v43 }
 0x22e   :  { %v222_v45 = vpop.xlane.xlu1 %221 }
 0x22f   :  { %1199 = vrsqrt.f32 %v225_v44  ;;  %v224_v46 = vmul.f32 0.03125, %v222_v45 }
 0x231   :  { %v226_v47 = vadd.f32 1e-05, %v224_v46 }
 0x233   :  { %1201 = vrsqrt.f32 %v226_v47 }
 0x239   :  { %v1200_v48 = vpop.eup %1199 }
 0x23a   :  { %v229_v49 = vmul.f32 %v1200_v48, %v213_v31 }
 0x23c   :  { %v235_v53 = vmul.f32 %v1032_v50, %v229_v49 }
 0x23d   :  { %v1202_v51 = vpop.eup %1201 }
 0x23e   :  { %v230_v52 = vmul.f32 %v1202_v51, %v214_v35  ;;  %v241_v56 = vadd.f32 %v1033_v54, %v235_v53 }
 0x240   :  { %v236_v55 = vmul.f32 %v1032_v50, %v230_v52 }
 0x242   :  { %v242_v57 = vadd.f32 %v1033_v54, %v236_v55 }
 0x244   :  { %v243_v58 = vpack.c.bf16 %v242_v57, %v241_v56 }
 0x246   :  { %1100 = vmatmul.mubr.msk.bf16.vlgmr.msra.gmra.mrb[0].mxu1 %vm203_vm1, %v243_v58 }
 0x319   :  { %v297_v60 = vpop.f32.mrb[0].mxu1 }
 0x31a   :  { %v1101_v61 = vpop.f32.mrb[1].mxu1  ;;  %v298_v63 = vadd.f32 %v1034_v59, %v297_v60 }
 0x31b   :  { %v300_v62 = vpop.f32.mrb[2].mxu1 }
 0x31c   :  { %v301_v1 = vadd.f32 %v1034_v59, %v300_v62  ;;  %v1102_v2 = vpop.f32.mrb[3].mxu1 }
 0x31e   :  { %v1162_v3 = vpack.i.bf16 %v301_v1, %v298_v63  ;;  %v1380_v4 = vpack.c.bf16 %v301_v1, %v298_v63 }
 0x320   :  { %1163 = vrot.lane.b32.xlu0 %v1162_v3, %s1248_s8  ;;  %316 = vrot.lane.b32.xlu1 %v1380_v4, %s1249_s9 }
 0x321   :  { %1107 = vmatprep.mubr.msk.bf16.mxu1 %vm320_vm3, %v1380_v4 }
 0x392   :  { %v1164_v5 = vpop.permute.xlu0 %1163  ;;  %v317_v6 = vpop.permute.xlu1 %316 }
 0x393   :  { %v1166_v7 = vunpack.i.h.bf16 %v1164_v5  ;;  %v1165_v8 = vunpack.i.l.bf16 %v1164_v5  ;;  %v328_v9 = vsel %vm320_vm3, %v317_v6, 0  ;;  %1153 = vmatprep.subr.msk.bf16.mxu1 %vm320_vm3, %v317_v6  ;;  %v1187_v5 = vld [vmem:[%s1522_s1 + $0x70] sm:$0xff]   ;;  %v1188_v6 = vld [vmem:[%s1522_s1 + $0x78] sm:$0xff]  }
 0x394   :  { %1104 = vmatpush3.bf16.xpose.msra.mxu1 %v328_v9 }
 0x395   :  { %v313_v10 = vpack.c.bf16 %v1166_v7, %v1165_v8 }
 0x397   :  { %318 = vrot.lane.b32.xlu1 %v313_v10, %s1249_s9 }
 0x409   :  { %v319_v11 = vpop.permute.xlu1 %318 }
 0x40a   :  { %v331_v12 = vsel %vm320_vm3, %v319_v11, 0  ;;  %1154 = vmatprep.subr.msk.bf16.mxu1 %vm320_vm3, %v319_v11 }
 0x40b   :  { %1106 = vmatpush3.bf16.xpose.msra.mxu1 %v331_v12 }
 0x412   :  { %1108 = vmatmul.mubr.msk.bf16.vlgmr.msra.gmra.mrb[4].mxu1 %vm320_vm3, %v313_v10 }
 0x4e5   :  { %v1109_v15 = vpop.f32.mrb[4].mxu1 }
 0x4e6   :  { %v376_v16 = vadd.f32 %v1109_v15, %v78_v13  ;;  %v367_v17 = vpop.f32.mrb[5].mxu1 }
 0x4e7   :  { %v368_v19 = vadd.f32 %v367_v17, %v76_v14  ;;  %v1110_v20 = vpop.f32.mrb[6].mxu1 }
 0x4e8   :  { %v370_v21 = vpop.f32.mrb[7].mxu1  ;;  %v388_v23 = vsel %vm203_vm1, %v376_v16, -inf  ;;  %v379_v29 = vadd.f32 %v1110_v20, %v79_v24 }
 0x4e9   :  { %v371_v26 = vadd.f32 %v370_v21, %v77_v18  ;;  %389 = vmax.xlane.f32.xlu0 %v388_v23  ;;  %v382_v27 = vsel %vm203_vm1, %v368_v19, -inf  ;;  %v1045_v18 = vld [vmem:[%s1524_s2 + $0x13] ss:$0 sm:$0xff] }
 0x4ea   :  { %383 = vmax.xlane.f32.xlu1 %v382_v27  ;;  %v391_v30 = vsel %vm203_vm1, %v379_v29, -inf }
 0x4eb   :  { %v385_v28 = vsel %vm203_vm1, %v371_v26, -inf }
 0x4ed   :  { %386 = vmax.xlane.f32.xlu0 %v385_v28 }
 0x4f1   :  { %392 = vmax.xlane.f32.xlu0 %v391_v30 }
 0x576   :  { %v390_v31 = vpop.xlane.xlu0 %389 }
 0x577   :  { %v396_v32 = vsub.f32 %v376_v16, %v390_v31  ;;  %v384_v33 = vpop.xlane.xlu1 %383 }
 0x578   :  { %v394_v34 = vsub.f32 %v368_v19, %v384_v33 }
 0x579   :  { %v402_v35 = vmul.f32 1.442695, %v396_v32 }
 0x57a   :  { %v398_v36 = vmul.f32 1.442695, %v394_v34  ;;  %v387_v37 = vpop.xlane.xlu0 %386 }
 0x57b   :  { %1203 = vpow2.f32 %v402_v35  ;;  %v395_v38 = vsub.f32 %v371_v26, %v387_v37 }
 0x57c   :  { %1205 = vpow2.f32 %v398_v36 }
 0x57d   :  { %v400_v42 = vmul.f32 1.442695, %v395_v38 }
 0x57e   :  { %v393_v39 = vpop.xlane.xlu0 %392 }
 0x57f   :  { %v397_v41 = vsub.f32 %v379_v29, %v393_v39  ;;  %v1189_v39 = vld [vmem:[%s1522_s1 + $0x80] sm:$0xff]  }
 0x581   :  { %v404_v43 = vmul.f32 1.442695, %v397_v41  ;;  %v1190_v41 = vld [vmem:[%s1522_s1 + $0x88] sm:$0xff]  }
 0x583   :  { %1207 = vpow2.f32 %v404_v43 }
 0x584   :  { %1209 = vpow2.f32 %v400_v42 }
 0x585   :  { %v1204_v44 = vpop.eup %1203 }
 0x586   :  { %v412_v45 = vsel %vm203_vm1, %v1204_v44, 0.0  ;;  %v1206_v46 = vpop.eup %1205 }
 0x587   :  { %413 = vadd.xlane.f32.xlu1 %v412_v45  ;;  %v406_v47 = vsel %vm203_vm1, %v1206_v46, 0.0 }
 0x58b   :  { %407 = vadd.xlane.f32.xlu1 %v406_v47 }
 0x58d   :  { %v1208_v48 = vpop.eup %1207 }
 0x58e   :  { %v415_v49 = vsel %vm203_vm1, %v1208_v48, 0.0  ;;  %v1210_v50 = vpop.eup %1209 }
 0x58f   :  { %416 = vadd.xlane.f32.xlu0 %v415_v49  ;;  %v409_v51 = vsel %vm203_vm1, %v1210_v50, 0.0  ;;  %v1046_v49 = vld [vmem:[%s1524_s2 + $0x14] ss:$0 sm:$0xff] }
 0x593   :  { %410 = vadd.xlane.f32.xlu0 %v409_v51 }
 0x59c   :  { %428 = vrot.lane.b32.xlu1 %v1380_v4, %s1250_s18 }
 0x5a9   :  { %430 = vrot.lane.b32.xlu0 %v313_v10, %s1250_s18 }
 0x614   :  { %v414_v52 = vpop.xlane.xlu1 %413 }
 0x618   :  { %v408_v53 = vpop.xlane.xlu1 %407 }
 0x61c   :  { %v417_v54 = vpop.xlane.xlu0 %416  ;;  %v429_v55 = vpop.permute.xlu1 %428 }
 0x61d   :  { %1111 = vmatprep.subr.bf16.mxu1 %v429_v55  ;;  %1211 = vrcp.f32 %v417_v54  ;;  %v1047_v54 = vld [vmem:[%s1524_s2 + $0x15] ss:$0 sm:$0xff] }
 0x61e   :  { %1112 = vmatpush3.bf16.msra.mxu1 %v429_v55  ;;  %1213 = vrcp.f32 %v408_v53 }
 0x61f   :  { %1215 = vrcp.f32 %v414_v52 }
 0x620   :  { %v411_v56 = vpop.xlane.xlu0 %410 }
 0x621   :  { %1217 = vrcp.f32 %v411_v56 }
 0x624   :  { %v431_v57 = vpop.permute.xlu0 %430 }
 0x625   :  { %1113 = vmatprep.subr.bf16.mxu1 %v431_v57 }
 0x626   :  { %1114 = vmatpush3.bf16.msra.mxu1 %v431_v57 }
 0x627   :  { %1119 = vmatprep.subr.bf16.mxu1 %v1246_v40  ;;  %v1212_v58 = vpop.eup %1211 }
 0x628   :  { %v1214_v59 = vpop.eup %1213  ;;  %v425_v62 = vmul.f32 %v1212_v58, %v1208_v48 }
 0x629   :  { %v1216_v60 = vpop.eup %1215  ;;  %v422_v63 = vmul.f32 %v1214_v59, %v1206_v46  ;;  %v1191_v59 = vld [vmem:[%s1522_s1 + $0x90] sm:$0xff]  }
 0x62a   :  { %v424_v2 = vmul.f32 %v1216_v60, %v1204_v44  ;;  %1136 = vmatpush3.bf16.msra.mxu0 %v1191_v59  ;;  %v1192_v60 = vld [vmem:[%s1522_s1 + $0x98] sm:$0xff]  }
 0x62b   :  { %v1218_v61 = vpop.eup %1217  ;;  %1137 = vmatprep.subr.bf16.mxu0 %v1246_v40 }
 0x62c   :  { %v423_v1 = vmul.f32 %v1218_v61, %v1210_v50  ;;  %v427_v4 = vpack.c.bf16 %v425_v62, %v424_v2  ;;  %v1193_v61 = vld [vmem:[%s1522_s1 + $0xa0] sm:$0xff]   ;;  %v1194_v62 = vld [vmem:[%s1522_s1 + $0xa8] sm:$0xff]  }
 0x62e   :  { %v426_v3 = vpack.c.bf16 %v423_v1, %v422_v63  ;;  %1138 = vmatpush3.bf16.msra.mxu0 %v1192_v60  ;;  %v1048_v63 = vld [vmem:[%s1524_s2 + $0x16] ss:$0 sm:$0xff] }
 0x62f   :  { %1139 = vmatprep.subr.bf16.mxu0 %v1246_v40 }
 0x630   :  { %1115 = vmatprep.mubr.msk.bf16.mxu1 %vm203_vm1, %v426_v3 }
 0x631   :  { %1116 = vmatmul.mubr.msk.bf16.vlgmr.msra.gmra.mrb[8].mxu1 %vm203_vm1, %v427_v4 }
 0x632   :  { %1123 = vmatprep.mubr.msk.bf16.mxu1 %vm1247_vm2, %v1246_v40  ;;  %1120 = vmatpush3.bf16.msra.mxu1 %v1187_v5 }
 0x633   :  { %1121 = vmatprep.subr.bf16.mxu1 %v1246_v40  ;;  %1140 = vmatpush3.bf16.msra.mxu0 %v1193_v61 }
 0x634   :  { %1141 = vmatprep.subr.bf16.mxu0 %v1246_v40 }
 0x636   :  { %1122 = vmatpush3.bf16.msra.mxu1 %v1188_v6 }
 0x637   :  { %1127 = vmatprep.subr.bf16.mxu1 %v1246_v40  ;;  %1142 = vmatpush3.bf16.msra.mxu0 %v1194_v62 }
 0x704   :  { %v1117_v7 = vpop.f32.mrb[8].mxu1 }
 0x705   :  { %v474_v8 = vpop.f32.mrb[9].mxu1 }
 0x706   :  { %v1118_v9 = vpop.f32.mrb[10].mxu1 }
 0x707   :  { %v1167_v10 = vpack.i.bf16 %v1118_v9, %v1117_v7  ;;  %v477_v11 = vpop.f32.mrb[11].mxu1 }
 0x709   :  { %1168 = vrot.lane.b32.xlu1 %v1167_v10, %s1251_s23 }
 0x77b   :  { %v1169_v12 = vpop.permute.xlu1 %1168 }
 0x77c   :  { %v1171_v13 = vunpack.i.h.bf16 %v1169_v12  ;;  %v1170_v14 = vunpack.i.l.bf16 %v1169_v12 }
 0x77e   :  { %v497_v15 = vsel %vm320_vm3, %v474_v8, %v1170_v14  ;;  %v498_v16 = vsel %vm320_vm3, %v477_v11, %v1171_v13 }
 0x77f   :  { %v499_v17 = vpack.c.bf16 %v498_v16, %v497_v15 }
 0x781   :  { %1124 = vmatmul.mubr.msk.bf16.vlgmr.msra.gmra.mrb[12].mxu1 %vm203_vm1, %v499_v17 }
 0x782   :  { %1131 = vmatprep.mubr.msk.bf16.mxu1 %vm1247_vm2, %v1246_v40  ;;  %1128 = vmatpush3.bf16.msra.mxu1 %v1189_v39  ;;  %v75_v39 = vld [vmem:[%s1524_s2 + $0x1a] sm:$0xff] }
 0x783   :  { %1129 = vmatprep.subr.bf16.mxu1 %v1246_v40 }
 0x786   :  { %1130 = vmatpush3.bf16.msra.mxu1 %v1190_v41 }
 0x787   :  { %1147 = vmatprep.subr.bf16.mxu1 %v1246_v40 }
 0x854   :  { %v549_v19 = vpop.f32.mrb[12].mxu1 }
 0x855   :  { %v556_v20 = vadd.f32 %v549_v19, %v1345_v22  ;;  %v1125_v21 = vpop.f32.mrb[13].mxu1 }
 0x856   :  { %v552_v23 = vpop.f32.mrb[14].mxu1 }
 0x857   :  { %v1433_v24 = vadd.f32 %v1045_v18, %v556_v20  ;;  %v557_v26 = vadd.f32 %v552_v23, %v1347_v25  ;;  %v1126_v27 = vpop.f32.mrb[15].mxu1 }
 0x859   :  { %v564_v28 = vsel %vm203_vm1, %v1433_v24, 0.0  ;;  %v563_v29 = vadd.f32 %v1045_v18, %v557_v26 }
 0x85a   :  { %565 = vadd.xlane.f32.xlu1 %v564_v28 }
 0x85b   :  { %v567_v30 = vsel %vm203_vm1, %v563_v29, 0.0 }
 0x85c   :  { %568 = vadd.xlane.f32.xlu0 %v567_v30 }
 0x8e7   :  { %v566_v31 = vpop.xlane.xlu1 %565 }
 0x8e8   :  { %v570_v32 = vmul.f32 0.03125, %v566_v31 }
 0x8e9   :  { %v569_v33 = vpop.xlane.xlu0 %568 }
 0x8ea   :  { %v572_v22 = vsub.f32 %v1433_v24, %v570_v32  ;;  %v571_v34 = vmul.f32 0.03125, %v569_v33 }
 0x8ec   :  { %v573_v35 = vsub.f32 %v563_v29, %v571_v34  ;;  %v574_v36 = vmul.f32 %v572_v22, %v572_v22  ;;  %v1057_v29 = vld [vmem:[%s1524_s2 + $0x17] ss:$0 sm:$0xff] }
 0x8ee   :  { %v576_v37 = vsel %vm203_vm1, %v574_v36, 0.0  ;;  %v575_v25 = vmul.f32 %v573_v35, %v573_v35 }
 0x8ef   :  { %577 = vadd.xlane.f32.xlu0 %v576_v37 }
 0x8f0   :  { %v579_v38 = vsel %vm203_vm1, %v575_v25, 0.0 }
 0x8f1   :  { %580 = vadd.xlane.f32.xlu1 %v579_v38 }
 0x97c   :  { %v578_v42 = vpop.xlane.xlu0 %577 }
 0x97d   :  { %v582_v43 = vmul.f32 0.03125, %v578_v42 }
 0x97e   :  { %v581_v44 = vpop.xlane.xlu1 %580 }
 0x97f   :  { %v584_v45 = vadd.f32 1e-05, %v582_v43  ;;  %v583_v46 = vmul.f32 0.03125, %v581_v44 }
 0x981   :  { %1219 = vrsqrt.f32 %v584_v45  ;;  %v585_v47 = vadd.f32 1e-05, %v583_v46 }
 0x983   :  { %1221 = vrsqrt.f32 %v585_v47 }
 0x98b   :  { %v1220_v48 = vpop.eup %1219 }
 0x98c   :  { %v588_v50 = vmul.f32 %v1220_v48, %v572_v22  ;;  %v1058_v48 = vld [vmem:[%s1524_s2 + $0x18] ss:$0 sm:$0xff] }
 0x98d   :  { %v1222_v51 = vpop.eup %1221 }
 0x98e   :  { %v594_v52 = vmul.f32 %v1046_v49, %v588_v50  ;;  %v589_v53 = vmul.f32 %v1222_v51, %v573_v35  ;;  %v1059_v50 = vld [vmem:[%s1524_s2 + $0x19] ss:$0 sm:$0xff] }
 0x990   :  { %v595_v55 = vmul.f32 %v1046_v49, %v589_v53  ;;  %v600_v56 = vadd.f32 %v1047_v54, %v594_v52  ;;  %v831_v52 = vld [vmem:[%s1525_s3] sm:$0xff] }
 0x992   :  { %v601_v57 = vadd.f32 %v1047_v54, %v595_v55  ;;  %v1062_v55 = vcombine.high %v831_v52, %v831_v52 }
 0x994   :  { %v602_v58 = vpack.c.bf16 %v601_v57, %v600_v56  ;;  %v1061_v57 = vcombine.low %v831_v52, %v831_v52 }
 0x996   :  { %1132 = vmatmul.mubr.msk.bf16.vlgmr.msra.gmra.mrb[16].mxu1 %vm203_vm1, %v602_v58  ;;  %v62_v58 = vld [vmem:[%s1522_s1 + $0xb0] sm:$0xf]  ;;  %v849_v59 = vsel %vm847_vm4, %v1061_v57, 0 }
 0x997   :  { %1149 = vmatprep.mubr.msk.bf16.mxu1 %vm1247_vm2, %v1246_v40 }
 0xa69   :  { %v656_v1 = vpop.f32.mrb[16].mxu1 }
 0xa6a   :  { %v657_v2 = vadd.f32 %v1048_v63, %v656_v1  ;;  %v1133_v3 = vpop.f32.mrb[17].mxu1 }
 0xa6b   :  { %v659_v4 = vpop.f32.mrb[18].mxu1 }
 0xa6c   :  { %v663_v5 = vmul.f32 %v657_v2, %v657_v2  ;;  %v660_v6 = vadd.f32 %v1048_v63, %v659_v4  ;;  %v1134_v7 = vpop.f32.mrb[19].mxu1 }
 0xa6e   :  { %v665_v8 = vmul.f32 %v663_v5, %v657_v2  ;;  %v664_v9 = vmul.f32 %v660_v6, %v660_v6 }
 0xa70   :  { %v667_v10 = vmul.f32 0.044715, %v665_v8  ;;  %v666_v40 = vmul.f32 %v664_v9, %v660_v6 }
 0xa72   :  { %v669_v11 = vadd.f32 %v667_v10, %v657_v2  ;;  %v668_v12 = vmul.f32 0.044715, %v666_v40 }
 0xa74   :  { %v671_v13 = vmul.f32 0.7978846, %v669_v11  ;;  %v670_v14 = vadd.f32 %v668_v12, %v660_v6 }
 0xa76   :  { %1223 = vtanh.f32 %v671_v13  ;;  %v672_v15 = vmul.f32 0.7978846, %v670_v14 }
 0xa78   :  { %1225 = vtanh.f32 %v672_v15 }
 0xa80   :  { %v1224_v16 = vpop.eup %1223 }
 0xa81   :  { %v675_v17 = vadd.f32 1.0, %v1224_v16 }
 0xa82   :  { %v1226_v18 = vpop.eup %1225 }
 0xa83   :  { %v677_v19 = vmul.f32 0.5, %v675_v17  ;;  %v676_v20 = vadd.f32 1.0, %v1226_v18 }
 0xa85   :  { %v678_v21 = vmul.f32 0.5, %v676_v20  ;;  %v679_v23 = vmul.f32 %v677_v19, %v657_v2 }
 0xa87   :  { %v680_v26 = vmul.f32 %v678_v21, %v660_v6 }
 0xa89   :  { %v681_v27 = vpack.c.bf16 %v680_v26, %v679_v23 }
 0xa8b   :  { %1144 = vmatmul.mubr.msk.bf16.vlgmr.msra.gmra.mrb[4].mxu0 %vm158_vm0, %v681_v27 }
 0xa8c   :  { %933 = vmatprep.mubr.bf16.mxu0 %v1245_v0 }
 0xb5e   :  { %v743_v28 = vpop.f32.mrb[4].mxu0 }
 0xb5f   :  { %v749_v30 = vadd.f32 %v743_v28, %v1433_v24  ;;  %v1145_v31 = vpop.f32.mrb[5].mxu0  ;;  %v832_v24 = vld [vmem:[%s1525_s3 + $0x8] sm:$0xff] }
 0xb60   :  { %v746_v32 = vpop.f32.mrb[6].mxu0  ;;  %v1064_v41 = vcombine.high %v832_v24, %v832_v24  ;;  %v1063_v42 = vcombine.low %v832_v24, %v832_v24 }
 0xb61   :  { %v1146_v33 = vpop.f32.mrb[7].mxu0  ;;  %v754_v22 = vadd.f32 %v1057_v29, %v749_v30 }
 0xb62   :  { %1067 = vmatprep.subr.msk.bf16.mxu0 %vm847_vm4, %v1064_v41  ;;  %v855_v43 = vsel %vm847_vm4, %v1063_v42, 0 }
 0xb63   :  { %v755_v34 = vsel %vm203_vm1, %v754_v22, 0.0  ;;  %902 = vmatpush1.bf16.msra.mxu0 %v855_v43 }
 0xb64   :  { %756 = vadd.xlane.f32.xlu0 %v755_v34 }
 0xb7a   :  { %781 = vperm.xlu0 %1172, %v75_v39  }
 0xbf1   :  { %v757_v35 = vpop.xlane.xlu0 %756 }
 0xbf2   :  { %v758_v36 = vmul.f32 0.03125, %v757_v35 }
 0xbf4   :  { %v759_v37 = vsub.f32 %v754_v22, %v758_v36 }
 0xbf6   :  { %v760_v25 = vmul.f32 %v759_v37, %v759_v37 }
 0xbf8   :  { %v761_v38 = vsel %vm203_vm1, %v760_v25, 0.0 }
 0xbf9   :  { %762 = vadd.xlane.f32.xlu1 %v761_v38  ;;  %v782_v60 = vpop.permute.xlu0 %781 }
 0xc86   :  { %v763_v44 = vpop.xlane.xlu1 %762 }
 0xc87   :  { %v764_v45 = vmul.f32 0.03125, %v763_v44 }
 0xc89   :  { %v765_v46 = vadd.f32 1e-05, %v764_v45 }
 0xc8b   :  { %1227 = vrsqrt.f32 %v765_v46 }
 0xc95   :  { %v1228_v47 = vpop.eup %1227 }
 0xc96   :  { %v767_v49 = vmul.f32 %v1228_v47, %v759_v37 }
 0xc98   :  { %v772_v51 = vmul.f32 %v1058_v48, %v767_v49 }
 0xc9a   :  { %v777_v53 = vadd.f32 %v1059_v50, %v772_v51 }
 0xc9c   :  { %v778_v54 = vpack.c.bf16 %v777_v53, %v777_v53 }
 0xc9e   :  { %v788_v56 = vsel %vm203_vm1, %v778_v54, 0 }
 0xc9f   :  { %1148 = vmatpush3.bf16.xpose.msra.mxu1 %v788_v56 }
 0xca0   :  { %1065 = vmatprep.subr.msk.bf16.mxu1 %vm847_vm4, %v1062_v55 }
 0xca6   :  { %1150 = vmatmul.mubr.msk.bf16.vlgmr.msra.gmra.mrb[20].mxu1 %vm203_vm1, %v62_v58 }
 0xca7   :  { %861 = vmatpush1.bf16.msra.mxu1 %v849_v59  ;;  %892 = vmatprep.mubr.bf16.mxu1 %v1245_v0 }
 0xd79   :  { %v824_v61 = vpop.f32.mrb[20].mxu1 }
 0xd7a   :  { %v825_v62 = vadd.f32 %v824_v61, %v782_v60  ;;  %v1151_v63 = vpop.f32.mrb[21].mxu1 }
 0xd7b   :  { %v827_v1 = vpop.f32.mrb[22].mxu1 }
 0xd7c   :  { %v830_v2 = vpack.c.bf16 %v825_v62, %v825_v62  ;;  %v1152_v3 = vpop.f32.mrb[23].mxu1 }
 0xd7e   :  { %1066 = vmatmul.mubr.msk.bf16.vlgmr.msra.gmra.mrb[24].mxu1 %vm843_vm5, %v830_v2  ;;  %1068 = vmatmul.mubr.msk.bf16.vlgmr.msra.gmra.mrb[8].mxu0 %vm843_vm5, %v830_v2 }
 0xe51   :  { %v894_v4 = vpop.f32.mrb[24].mxu1  ;;  %v935_v5 = vpop.f32.mrb[8].mxu0 }
 0xe52   :  { %v942_v6 = vrot.slane %v894_v4, 4  ;;  %v954_v7 = vrot.slane %v935_v5, 4  ;;  %v896_v8 = vpop.f32.mrb[25].mxu1  ;;  %v937_v9 = vpop.f32.mrb[9].mxu0 }
 0xe53   :  { %v948_v10 = vrot.slane %v896_v8, 4  ;;  %v960_v40 = vrot.slane %v937_v9, 4  ;;  %v898_v11 = vpop.f32.mrb[26].mxu1  ;;  %v939_v0 = vpop.f32.mrb[10].mxu0 }
 0xe54   :  { %v943_v12 = vmax.f32 %v894_v4, %v942_v6  ;;  %v955_v13 = vmax.f32 %v935_v5, %v954_v7  ;;  %v899_v14 = vpop.f32.mrb[27].mxu1  ;;  %v940_v15 = vpop.f32.mrb[11].mxu0 }
 0xe55   :  { %v949_v16 = vmax.f32 %v896_v8, %v948_v10  ;;  %v961_v17 = vmax.f32 %v937_v9, %v960_v40 }
 0xe56   :  { %v944_v18 = vrot.slane %v943_v12, 2  ;;  %v956_v19 = vrot.slane %v955_v13, 2 }
 0xe57   :  { %v950_v20 = vrot.slane %v949_v16, 2  ;;  %v962_v21 = vrot.slane %v961_v17, 2 }
 0xe58   :  { %v945_v23 = vmax.f32 %v943_v12, %v944_v18  ;;  %v957_v26 = vmax.f32 %v955_v13, %v956_v19 }
 0xe59   :  { %v951_v27 = vmax.f32 %v949_v16, %v950_v20  ;;  %v963_v28 = vmax.f32 %v961_v17, %v962_v21 }
 0xe5a   :  { %v946_v29 = vrot.slane %v945_v23, 1  ;;  %v958_v30 = vrot.slane %v957_v26, 1 }
 0xe5b   :  { %v952_v31 = vrot.slane %v951_v27, 1  ;;  %v964_v32 = vrot.slane %v963_v28, 1 }
 0xe5c   :  { %v947_v33 = vmax.f32 %v945_v23, %v946_v29  ;;  %v959_v22 = vmax.f32 %v957_v26, %v958_v30 }
 0xe5d   :  { %v953_v34 = vmax.f32 %v951_v27, %v952_v31  ;;  %v965_v35 = vmax.f32 %v963_v28, %v964_v32 }
 0xe5e   :  { %v966_v36 = vsub.f32 %v894_v4, %v947_v33  ;;  %v968_v37 = vsub.f32 %v935_v5, %v959_v22 }
 0xe5f   :  { %v967_v25 = vsub.f32 %v896_v8, %v953_v34  ;;  %v969_v38 = vsub.f32 %v937_v9, %v965_v35 }
 0xe60   :  { %v970_v39 = vmul.f32 1.442695, %v966_v36  ;;  %v974_v24 = vmul.f32 1.442695, %v968_v37 }
 0xe61   :  { %v972_v41 = vmul.f32 1.442695, %v967_v25  ;;  %v976_v42 = vmul.f32 1.442695, %v969_v38 }
 0xe62   :  { %1229 = vpow2.f32 %v970_v39 }
 0xe63   :  { %1231 = vpow2.f32 %v974_v24 }
 0xe64   :  { %1233 = vpow2.f32 %v972_v41 }
 0xe65   :  { %1235 = vpow2.f32 %v976_v42 }
 0xe6c   :  { %v1230_v43 = vpop.eup %1229 }
 0xe6d   :  { %v1232_v44 = vpop.eup %1231  ;;  %v978_v45 = vrot.slane %v1230_v43, 4 }
 0xe6e   :  { %v1234_v46 = vpop.eup %1233  ;;  %v990_v47 = vrot.slane %v1232_v44, 4 }
 0xe6f   :  { %v1236_v48 = vpop.eup %1235  ;;  %v979_v49 = vadd.f32 %v1230_v43, %v978_v45  ;;  %v984_v50 = vrot.slane %v1234_v46, 4 }
 0xe70   :  { %v991_v51 = vadd.f32 %v1232_v44, %v990_v47  ;;  %v996_v52 = vrot.slane %v1236_v48, 4 }
 0xe71   :  { %v980_v53 = vrot.slane %v979_v49, 2  ;;  %v985_v54 = vadd.f32 %v1234_v46, %v984_v50 }
 0xe72   :  { %v992_v55 = vrot.slane %v991_v51, 2  ;;  %v997_v56 = vadd.f32 %v1236_v48, %v996_v52 }
 0xe73   :  { %v981_v57 = vadd.f32 %v980_v53, %v979_v49  ;;  %v986_v58 = vrot.slane %v985_v54, 2 }
 0xe74   :  { %v993_v59 = vadd.f32 %v992_v55, %v991_v51  ;;  %v998_v60 = vrot.slane %v997_v56, 2 }
 0xe75   :  { %v982_v61 = vrot.slane %v981_v57, 1  ;;  %v987_v62 = vadd.f32 %v986_v58, %v985_v54 }
 0xe76   :  { %v994_v63 = vrot.slane %v993_v59, 1  ;;  %v999_v1 = vadd.f32 %v998_v60, %v997_v56 }
 0xe77   :  { %v983_v2 = vadd.f32 %v982_v61, %v981_v57  ;;  %v988_v3 = vrot.slane %v987_v62, 1 }
 0xe78   :  { %v995_v4 = vadd.f32 %v994_v63, %v993_v59  ;;  %v1000_v5 = vrot.slane %v999_v1, 1 }
 0xe79   :  { %1237 = vrcp.f32 %v983_v2  ;;  %v989_v6 = vadd.f32 %v988_v3, %v987_v62 }
 0xe7a   :  { %1239 = vrcp.f32 %v995_v4  ;;  %v1001_v7 = vadd.f32 %v1000_v5, %v999_v1 }
 0xe7b   :  { %1241 = vrcp.f32 %v989_v6 }
 0xe7c   :  { %1243 = vrcp.f32 %v1001_v7 }
 0xe83   :  { %v1238_v8 = vpop.eup %1237 }
 0xe84   :  { %v1240_v9 = vpop.eup %1239  ;;  %v1003_v10 = vmul.f32 %v1238_v8, %v1230_v43 }
 0xe85   :  { %v1242_v40 = vpop.eup %1241  ;;  %v1007_v11 = vmul.f32 %v1240_v9, %v1232_v44 }
 0xe86   :  { %v1244_v0 = vpop.eup %1243  ;;  %1010 = vst [vmem:[%s1526_s4] sm:$0xff] %v1003_v10  ;;  %v1005_v12 = vmul.f32 %v1242_v40, %v1234_v46 }
 0xe87   :  { %1069 = vst [vmem:[%s1526_s4 + $0x10] sm:$0xff] %v1007_v11  ;;  %v1009_v13 = vmul.f32 %v1244_v0, %v1236_v48 }
 0xe88   :  { %1011 = vst [vmem:[%s1526_s4 + $0x8] sm:$0xff] %v1005_v12 }
 0xe89   :  { %1070 = vst [vmem:[%s1526_s4 + $0x18] sm:$0xff] %v1009_v13 }

</bundles_post_ra>
